<compile_context>
chip_gen: v7x
topology: tpu7x:2x2x1
jax: 0.10.0
libtpu: 0.0.40
codegen_flags: <defaults>
</compile_context>

<pallas_src>
import functools

import jax
import jax.numpy as jnp
from jax.experimental import pallas as pl
from jax.experimental.pallas import tpu as pltpu

NEG_SLOPE = 0.01  # torch.nn.LeakyReLU default negative_slope


def _round_up(x, m):
    return ((x + m - 1) // m) * m


def _choose_tile(dim, cap, granule):
    """Pick (tile, padded_dim).

    Pads `dim` to `granule`, then picks the largest granule-multiple tile
    <= cap that divides the padded dim.  Only if no reasonably-sized divisor
    exists (>= cap/4) does it fall back to padding the dim to a multiple of
    cap (waste bounded by < cap), instead of always rounding up to the tile.
    """
    cap = max(granule, (cap // granule) * granule)
    d = _round_up(dim, granule)
    if d <= cap:
        return d, d
    best = None
    for t in range(cap, granule - 1, -granule):
        if d % t == 0:
            best = t
            break
    if best is not None and best >= max(granule, cap // 4):
        return best, d
    return cap, _round_up(d, cap)


def _divisor_tile(d, cap, granule):
    """Largest granule-multiple tile <= cap dividing an already-padded dim."""
    cap = max(granule, (cap // granule) * granule)
    if d <= cap:
        return d
    for t in range(cap, granule - 1, -granule):
        if d % t == 0:
            return t
    return granule


def _linear_leakyrelu_kernel(x_ref, w_ref, b_ref, o_ref, acc_ref, *, nk):
    # x_ref : (tm, tk)  input tile (batch on sublanes, features on lanes)
    # w_ref : (tk, tn)  weight tile, already transposed to (in, out) layout
    # b_ref : (1, tn)   bias tile (f32)
    # o_ref : (tm, tn)  output tile
    # acc_ref:(tm, tn)  f32 accumulator scratch (unused when nk == 1)
    k = pl.program_id(2)

    # Plain KN contraction -> MXU, f32 accumulation regardless of input dtype.
    partial = jnp.dot(x_ref[...], w_ref[...],
                      preferred_element_type=jnp.float32)

    def _epilogue(y):
        y = y + b_ref[...].astype(jnp.float32)
        y = jnp.where(y >= 0, y, NEG_SLOPE * y)  # LeakyReLU on the VPU (f32)
        # TODO(synk): training-mode Dropout1d (zero whole channels with prob p,
        #             scale by 1/(1-p)) not implemented; eval-mode identity.
        o_ref[...] = y.astype(o_ref.dtype)

    if nk == 1:
        # Single K step: no accumulator traffic at all.
        _epilogue(partial)
    else:
        @pl.when(k == 0)
        def _init():
            acc_ref[...] = partial

        @pl.when((k > 0) & (k < nk - 1))
        def _accumulate():
            acc_ref[...] += partial

        @pl.when(k == nk - 1)
        def _finalize():
            # Last K step fused into the epilogue: skip the final acc store.
            _epilogue(acc_ref[...] + partial)


def prepare_linear_params(weight, bias, *, tile_n=512, tile_k=1024,
                          param_dtype=jnp.bfloat16):
    """One-time (model-load) weight/bias preparation.

    weight: (out_dim, in_dim)  PyTorch nn.Linear layout
    bias:   (out_dim,)
    Returns (w_p, b_p): weight transposed to (K, N) = (in, out) layout, padded
    to (8,128)-friendly sizes and cast to `param_dtype` (bf16 by default for
    the MXU fast path); bias padded to (1, N) in f32.
    """
    out_dim, in_dim = weight.shape
    _, K = _choose_tile(in_dim, tile_k, 128)
    _, N = _choose_tile(out_dim, tile_n, 128)
    w_p = jnp.zeros((K, N), param_dtype).at[:in_dim, :out_dim].set(
        weight.T.astype(param_dtype))
    b_p = jnp.zeros((1, N), jnp.float32).at[0, :out_dim].set(
        bias.astype(jnp.float32))
    return w_p, b_p


@functools.partial(
    jax.jit, static_argnames=("out_dim", "tile_m", "tile_n", "tile_k"))
def linear_layer_forward(x, w_p, b_p, *, out_dim, tile_m=512, tile_n=512,
                         tile_k=1024):
    """y = LeakyReLU(x @ W.T + b); Dropout1d identity (eval mode).

    x:   (B, in_dim)
    w_p: (K, N) padded, transposed weight from prepare_linear_params
    b_p: (1, N) padded f32 bias from prepare_linear_params
    """
    B, in_dim = x.shape
    K, N = w_p.shape
    assert in_dim <= K and out_dim <= N
    out_dtype = x.dtype
    compute_dtype = w_p.dtype  # bf16 by default; f32 if prep opted out

    tm, M = _choose_tile(B, tile_m, 8)
    tk = _divisor_tile(K, tile_k, 128)
    tn = _divisor_tile(N, tile_n, 128)

    # v7x (2 TensorCores): make sure at least 2 blocks exist along a
    # "parallel" axis when the problem would otherwise be a single block.
    if (M // tm) * (N // tn) == 1 and N >= 256:
        start = (tn // 2) - ((tn // 2) % 128)
        for t in range(start, 127, -128):
            if N % t == 0:
                tn = t
                break

    # Input padding / cast — statically skipped when already aligned.
    if B == M and in_dim == K:
        x_p = x if x.dtype == compute_dtype else x.astype(compute_dtype)
    else:
        x_p = jnp.zeros((M, K), compute_dtype).at[:B, :in_dim].set(
            x.astype(compute_dtype))

    grid = (M // tm, N // tn, K // tk)
    kernel = functools.partial(_linear_leakyrelu_kernel, nk=grid[2])

    bytes_accessed = (
        M * K * jnp.dtype(compute_dtype).itemsize       # x
        + K * N * jnp.dtype(compute_dtype).itemsize     # W
        + N * 4                                         # bias
        + M * N * jnp.dtype(out_dtype).itemsize)        # out

    out_p = pl.pallas_call(
        kernel,
        out_shape=jax.ShapeDtypeStruct((M, N), out_dtype),
        grid_spec=pltpu.PrefetchScalarGridSpec(
            num_scalar_prefetch=0,
            grid=grid,
            in_specs=[
                pl.BlockSpec((tm, tk), lambda i, j, k: (i, k)),   # x
                pl.BlockSpec((tk, tn), lambda i, j, k: (k, j)),   # W (K,N)
                pl.BlockSpec((1, tn), lambda i, j, k: (0, j)),    # bias
            ],
            out_specs=pl.BlockSpec((tm, tn), lambda i, j, k: (i, j)),
            scratch_shapes=[pltpu.VMEM((tm, tn), jnp.float32)],
        ),
        compiler_params=pltpu.CompilerParams(
            dimension_semantics=("parallel", "parallel", "arbitrary"),
        ),
        cost_estimate=pl.CostEstimate(
            flops=2 * M * N * K,
            transcendentals=0,
            bytes_accessed=int(bytes_accessed),
        ),
    )(x_p, w_p, b_p)

    if B == M and out_dim == N:
        return out_p
    return out_p[:B, :out_dim]


def reference_forward(x, weight, bias):
    y = x @ weight.T + bias
    return jnp.where(y >= 0, y, NEG_SLOPE * y)


if __name__ == "__main__":
    key = jax.random.PRNGKey(0)

    # --- Test 1: shapes consistent with LinearLayer(in_dim=32, out_dim=64, 0.25)
    B, IN_DIM, OUT_DIM = 16, 32, 64
    kx, kw, kb = jax.random.split(key, 3)
    x = jax.random.normal(kx, (B, IN_DIM), dtype=jnp.float32)
    bound = 1.0 / (IN_DIM ** 0.5)
    weight = jax.random.uniform(kw, (OUT_DIM, IN_DIM), jnp.float32, -bound, bound)
    bias = jax.random.uniform(kb, (OUT_DIM,), jnp.float32, -bound, bound)
    ref = reference_forward(x, weight, bias)

    # Default bf16 MXU-input path (f32 accumulation + epilogue).
    w_bf, b_bf = prepare_linear_params(weight, bias)
    out_bf = jax.block_until_ready(
        linear_layer_forward(x, w_bf, b_bf, out_dim=OUT_DIM))
    assert out_bf.shape == (B, OUT_DIM)
    assert jnp.allclose(out_bf, ref, atol=5e-2, rtol=5e-2), "bf16 mismatch"

    # Explicit f32 opt-out — exact check.
    w_f32, b_f32 = prepare_linear_params(weight, bias, param_dtype=jnp.float32)
    out_f32 = jax.block_until_ready(
        linear_layer_forward(x, w_f32, b_f32, out_dim=OUT_DIM))
    assert out_f32.shape == (B, OUT_DIM)
    assert jnp.allclose(out_f32, ref, atol=1e-5, rtol=1e-5), "f32 mismatch"

    # --- Test 2: multi-block grid (exercises K accumulation + N splitting).
    B2, IN2, OUT2 = 24, 256, 384
    k2x, k2w, k2b = jax.random.split(jax.random.PRNGKey(0), 3)
    x2 = jax.random.normal(k2x, (B2, IN2), dtype=jnp.float32)
    bound2 = 1.0 / (IN2 ** 0.5)
    weight2 = jax.random.uniform(k2w, (OUT2, IN2), jnp.float32, -bound2, bound2)
    bias2 = jax.random.uniform(k2b, (OUT2,), jnp.float32, -bound2, bound2)
    ref2 = reference_forward(x2, weight2, bias2)

    w2_p, b2_p = prepare_linear_params(weight2, bias2, tile_k=128)
    out2 = jax.block_until_ready(
        linear_layer_forward(x2, w2_p, b2_p, out_dim=OUT2, tile_k=128))
    assert out2.shape == (B2, OUT2)
    assert jnp.allclose(out2, ref2, atol=5e-2, rtol=5e-2), "multi-block mismatch"

    print("KERNEL_OK")
</pallas_src>

<mosaic_0001>
module attributes {stable_mosaic.version = 11 : i64} {
  func.func @_linear_leakyrelu_kernel(%arg0: i32, %arg1: i32, %arg2: i32, %arg3: memref<16x128xbf16, #tpu.memory_space<vmem>>, %arg4: memref<128x128xbf16, #tpu.memory_space<vmem>>, %arg5: memref<1x128xf32, #tpu.memory_space<vmem>>, %arg6: memref<16x128xf32, #tpu.memory_space<vmem>>, %arg7: memref<16x128xf32, #tpu.memory_space<vmem>>) attributes {dimension_semantics = [#tpu.dimension_semantics<parallel>, #tpu.dimension_semantics<parallel>, #tpu.dimension_semantics<arbitrary>], iteration_bounds = array<i64: 1, 1, 1>, scalar_prefetch = 0 : i64, scratch_operands = 1 : i64, tpu.core_type = #tpu.core_type<tc>, window_params = [{transform_indices = @transform_0, window_bounds = array<i64: 16, 128>}, {transform_indices = @transform_1, window_bounds = array<i64: 128, 128>}, {transform_indices = @transform_2, window_bounds = array<i64: 1, 128>}, {transform_indices = @transform_3, window_bounds = array<i64: 16, 128>}]} {
    %c0 = arith.constant 0 : index
    %c0_0 = arith.constant 0 : index
    %0 = vector.load %arg3[%c0, %c0_0] : memref<16x128xbf16, #tpu.memory_space<vmem>>, vector<16x128xbf16>
    %c0_1 = arith.constant 0 : index
    %c0_2 = arith.constant 0 : index
    %1 = vector.load %arg4[%c0_1, %c0_2] : memref<128x128xbf16, #tpu.memory_space<vmem>>, vector<128x128xbf16>
    %cst = arith.constant dense<0.000000e+00> : vector<16x128xf32>
    %2 = tpu.matmul %0, %1, %cst {dimension_numbers = #tpu.dot_dimension_numbers<[1], [0], [0], [1], [0, 0, 1, 1], [], []>} : vector<16x128xbf16>, vector<128x128xbf16>, vector<16x128xf32> -> vector<16x128xf32>
    %c0_3 = arith.constant 0 : index
    %c0_4 = arith.constant 0 : index
    %3 = vector.load %arg5[%c0_3, %c0_4] : memref<1x128xf32, #tpu.memory_space<vmem>>, vector<1x128xf32>
    %4 = vector.broadcast %3 : vector<1x128xf32> to vector<16x128xf32>
    %5 = arith.addf %2, %4 : vector<16x128xf32>
    %cst_5 = arith.constant 0.000000e+00 : f32
    %6 = vector.broadcast %cst_5 : f32 to vector<16x128xf32>
    %7 = arith.cmpf oge, %5, %6 : vector<16x128xf32>
    %cst_6 = arith.constant 0.00999999977 : f32
    %8 = vector.broadcast %cst_6 : f32 to vector<16x128xf32>
    %9 = arith.mulf %8, %5 : vector<16x128xf32>
    %10 = arith.select %7, %5, %9 : vector<16x128xi1>, vector<16x128xf32>
    %c0_7 = arith.constant 0 : index
    %c0_8 = arith.constant 0 : index
    %11 = vector.load %arg6[%c0_7, %c0_8] : memref<16x128xf32, #tpu.memory_space<vmem>>, vector<16x128xf32>
    tpu.vector_store %arg6[%c0_7, %c0_8], %10 {strides = array<i32>} : memref<16x128xf32, #tpu.memory_space<vmem>>, vector<16x128xf32>,
    return
  }
  func.func @transform_0(%arg0: i32, %arg1: i32, %arg2: i32) -> (i32, i32) {
    %c0_i32 = arith.constant 0 : i32
    return %arg0, %arg2 : i32, i32
  }
  func.func @transform_1(%arg0: i32, %arg1: i32, %arg2: i32) -> (i32, i32) {
    %c0_i32 = arith.constant 0 : i32
    return %arg2, %arg1 : i32, i32
  }
  func.func @transform_2(%arg0: i32, %arg1: i32, %arg2: i32) -> (i32, i32) {
    %c0_i32 = arith.constant 0 : i32
    %c0_i32_0 = arith.constant 0 : i32
    return %c0_i32, %arg1 : i32, i32
  }
  func.func @transform_3(%arg0: i32, %arg1: i32, %arg2: i32) -> (i32, i32) {
    %c0_i32 = arith.constant 0 : i32
    return %arg0, %arg1 : i32, i32
  }
}

</mosaic_0001>

<bundles_post_ra>
// kernel: linear_layer_forward.1
= control target key start
LH: loop header
LB: loop body
LE: loop exit
PB: predicated region body
PF: predicated region fallthrough
CT: control target
= control target key end

     0   :  { %8 = vsyncpa [#allocation4], 0  ;;  %s337_s0 = inlined_call_operand.vmem [shape: bf16[16,128], index: 0, kind: input, shape index: {}]   ;;  %s338_s1 = inlined_call_operand.hbm [shape: bf16[128,128], index: 1, kind: input, shape index: {}]   ;;  %s339_s2 = inlined_call_operand.vmem [shape: f32[1,128], index: 2, kind: input, shape index: {}]   ;;  %s340_s3 = inlined_call_operand.hbm [shape: f32[16,128], index: 3, kind: output, shape index: {}]  }
   0x1   :  { %9 = vsyncpa [#allocation5], 0  ;;  %s279_s12 = smov [#allocation3]   ;;  %s231_s16 = scalar_lea.hbm %s338_s1, 1024 }
   0x2   :  { %s17_s13 = sshll.u32 %s279_s12, 4  ;;  %p232_p0 = scmp.ne.s32.totalorder %s338_s1, %s231_s16  ;;  %s18_s13 = int_to_ptr.vmem [resolvable:$true] %s17_s13 }
   0x3   :  { %p235_p1 = scmp.lt.u32.totalorder %s231_s16, %s338_s1 }
   0x5   :  { %p237_p2 = pnand %p235_p1, %p232_p0 }
   0x7   :  { %240 = shalt.err (!%p237_p2)
}
   0x8   :  { %s241_s21 = scalar_lea.vmem %s18_s13, 1024  ;;  %p246_p4 = scmp.lt.s32.totalorder %s18_s13, %s18_s13 }
   0x9   :  { %p242_p3 = scmp.ne.s32.totalorder %s18_s13, %s241_s21  ;;  %p247_p5 = scmp.lt.s32.totalorder %s241_s21, %s241_s21 }
   0xb   :  { %p248_p6 = por %p247_p5, %p246_p4 }
   0xd   :  { %p249_p7 = pnand %p248_p6, %p242_p3 }
   0xf   :  { %252 = shalt.err (!%p249_p7)
}
  0x10   :  { %s280_s22 = smov 64   ;;  %s281_s23 = smov 4  }
  0x11   :  { %23 = dma.hbm_to_vmem [thread:$0]  %s338_s1, 1024, %s18_s13, [#allocation4], %s280_s22, %s280_s22, %s281_s23  }
  0x12   :  { %275 = dma.done.wait [#allocation4], 1024  }
  0x13   :  { %276 = vsyncadd [#allocation4], 4294966272  ;;  %v282_v0 = vmov 0.0   ;;  %vm283_vm0 = vmmov 0   ;;  %v222_v1 = vld [vmem:[#allocation3] sm:$0xff]   ;;  %v223_v2 = vld [vmem:[#allocation3 + $0x8] sm:$0xff]  }
  0x14   :  { %194 = vmatprep.subr.bf16.mxu0 %v282_v0  ;;  %210 = vmatprep.mubr.msk.bf16.mxu0 %vm283_vm0, %v282_v0  ;;  %v224_v3 = vld [vmem:[#allocation3 + $0x10] sm:$0xff]   ;;  %v225_v4 = vld [vmem:[#allocation3 + $0x18] sm:$0xff]   ;;  %v226_v5 = vld [vmem:[#allocation3 + $0x20] sm:$0xff]   ;;  %s284_s29 = smov [#allocation6]  }
  0x15   :  { %195 = vmatpush3.bf16.msra.mxu0 %v222_v1  ;;  %v227_v6 = vld [vmem:[#allocation3 + $0x28] sm:$0xff]   ;;  %v228_v7 = vld [vmem:[#allocation3 + $0x30] sm:$0xff]   ;;  %v229_v8 = vld [vmem:[#allocation3 + $0x38] sm:$0xff]   ;;  %s163_s30 = sshll.u32 %s284_s29, 4  ;;  %s164_s30 = int_to_ptr.vmem [resolvable:$true] %s163_s30 }
  0x16   :  { %196 = vmatprep.subr.bf16.mxu0 %v282_v0  ;;  %v230_v9 = vld [vmem:[%s337_s0] sm:$0xff]   ;;  %s253_s0 = scalar_lea.vmem %s164_s30, 256  ;;  %p258_p9 = scmp.lt.s32.totalorder %s164_s30, %s164_s30 }
  0x17   :  { %v175_v10 = vld [vmem:[%s339_s2] ss:$0 sm:$0xff]  ;;  %p254_p8 = scmp.ne.s32.totalorder %s164_s30, %s253_s0  ;;  %p259_p10 = scmp.lt.s32.totalorder %s253_s0, %s253_s0 }
  0x19   :  { %197 = vmatpush3.bf16.msra.mxu0 %v223_v2  ;;  %p260_p11 = por %p259_p10, %p258_p9 }
  0x1a   :  { %198 = vmatprep.subr.bf16.mxu0 %v282_v0 }
  0x1b   :  { %p261_p12 = pnand %p260_p11, %p254_p8 }
  0x1d   :  { %199 = vmatpush3.bf16.msra.mxu0 %v224_v3 }
  0x1e   :  { %200 = vmatprep.subr.bf16.mxu0 %v282_v0 }
  0x21   :  { %201 = vmatpush3.bf16.msra.mxu0 %v225_v4 }
  0x22   :  { %202 = vmatprep.subr.bf16.mxu0 %v282_v0 }
  0x25   :  { %203 = vmatpush3.bf16.msra.mxu0 %v226_v5 }
  0x26   :  { %204 = vmatprep.subr.bf16.mxu0 %v282_v0 }
  0x29   :  { %205 = vmatpush3.bf16.msra.mxu0 %v227_v6 }
  0x2a   :  { %206 = vmatprep.subr.bf16.mxu0 %v282_v0 }
  0x2d   :  { %207 = vmatpush3.bf16.msra.mxu0 %v228_v7 }
  0x2e   :  { %208 = vmatprep.subr.bf16.mxu0 %v282_v0 }
  0x31   :  { %209 = vmatpush3.bf16.msra.mxu0 %v229_v8 }
  0x34   :  { %211 = vmatmul.mubr.bf16.vlgmr.msra.gmra.mrb[0].mxu0 %v230_v9 }
 0x107   :  { %v143_v11 = vpop.f32.mrb[0].mxu0 }
 0x108   :  { %v144_v12 = vadd.f32 %v175_v10, %v143_v11  ;;  %v212_v13 = vpop.f32.mrb[1].mxu0 }
 0x109   :  { %v146_v14 = vpop.f32.mrb[2].mxu0 }
 0x10a   :  { %vm150_vm1 = vcmp.ge.f32.partialorder %v144_v12, 0.0  ;;  %v152_v15 = vmul.f32 0.01, %v144_v12  ;;  %v147_v16 = vadd.f32 %v175_v10, %v146_v14  ;;  %v213_v17 = vpop.f32.mrb[3].mxu0 }
 0x10c   :  { %v154_v18 = vsel %vm150_vm1, %v144_v12, %v152_v15  ;;  %vm151_vm2 = vcmp.ge.f32.partialorder %v147_v16, 0.0  ;;  %v153_v19 = vmul.f32 0.01, %v147_v16 }
 0x10d   :  { %156 = vst [vmem:[#allocation6] sm:$0xff] %v154_v18 }
 0x10e   :  { %v155_v20 = vsel %vm151_vm2, %v147_v16, %v153_v19 }
 0x10f   :  { %157 = vst [vmem:[#allocation6 + $0x8] sm:$0xff] %v155_v20 }
 0x110   :  { %264 = shalt.err (!%p261_p12)
}
 0x111   :  { %s265_s5 = scalar_lea.hbm %s340_s3, 256 }
 0x112   :  { %p266_p13 = scmp.ne.s32.totalorder %s340_s3, %s265_s5  ;;  %p269_p0 = scmp.lt.u32.totalorder %s265_s5, %s340_s3 }
 0x114   :  { %p271_p1 = pnand %p269_p0, %p266_p13 }
 0x116   :  { %274 = shalt.err (!%p271_p1)
}
 0x117   :  { %s285_s10 = smov 128   ;;  %s286_s11 = smov 8  }
 0x118   :  { %169 = dma.vmem_to_hbm [thread:$0]  %s164_s30, 256, %s340_s3, [#allocation5], %s285_s10, %s285_s10, %s286_s11  }
 0x119   :  { %277 = dma.done.wait [#allocation5], 256  }
 0x11a   :  { %278 = vsyncadd [#allocation5], 4294967040 }
 0x11b   :  { %173 = vsyncpa [#allocation4], 1 }
 0x11c   :  { %174 = vsyncpa [#allocation5], 1 }

</bundles_post_ra>
